<compile_context>
chip_gen: v5e
topology: v5e:2x2
jax: 0.10.0
libtpu: 0.0.40
codegen_flags: <defaults>
</compile_context>

<pallas_src>
import math
from functools import partial

import jax
import jax.numpy as jnp
from jax.experimental import pallas as pl
from jax.experimental.pallas import tpu as pltpu


def _round_up(n, m):
    return ((n + m - 1) // m) * m


def _drqn_kernel(num_layers, rnn_size, gate_stride, in_pad):
    """Kernel closed over the static layer count and layout widths.

    rnn_size    (H) : true hidden width
    gate_stride (Hg): lane offset between the r/z/n gate columns in the fused
                      weight slab (== H when 3*H <= 128, else round_up(H, 128))
    in_pad      (Kp): padded contraction width every layer's input is held at
    """
    H, Hg, Kp = rnn_size, gate_stride, in_pad

    def kernel(x_ref, w_ref, b_ref, wout_ref, bout_ref, out_ref):
        # x_ref:    (Np, Kp)     f32  zero-padded input batch
        # w_ref:    (L, Kp, Gp)  f32  fused [W_r | W_z | W_n] at lane offsets 0/Hg/2Hg
        # b_ref:    (L, 2, Gp)   f32  row0 = [bih_r+bhh_r | bih_z+bhh_z | bih_n],
        #                             row1 = bhh_n placed at the n-gate lane offset
        # wout_ref: (Kp, Ap)     f32  zero-padded Linear weight
        # bout_ref: (1, Ap)      f32  Linear bias; padded action lanes = -1e30
        h = x_ref[...]                                          # (Np, Kp)

        for l in range(num_layers):                             # unrolled at trace time
            w = w_ref[l]                                        # (Kp, Gp) f32 -- no cast
            b = b_ref[l]                                        # (2, Gp)
            # One MXU push per layer; h0 == 0 so there is no hidden-state matmul.
            g = jnp.dot(h, w, preferred_element_type=jnp.float32) + b[0:1, :]
            r = jax.nn.sigmoid(g[:, 0:H])                       # static lane slices
            z = jax.nn.sigmoid(g[:, Hg:Hg + H])
            n = jnp.tanh(g[:, 2 * Hg:2 * Hg + H] + r * b[1:2, 2 * Hg:2 * Hg + H])
            h = (1.0 - z) * n                                   # "+ z * h_prev" == 0 dropped
            if H < Kp:                                          # static; no-op in the demo
                h = jnp.concatenate(
                    [h, jnp.zeros((h.shape[0], Kp - H), jnp.float32)], axis=-1)

        # Lane-dense (Np, Ap=128) logits: unmasked stores, full-vreg reduces.
        logits = (jnp.dot(h, wout_ref[...], preferred_element_type=jnp.float32)
                  + bout_ref[...])
        # Padded action lanes carry a -1e30 bias -> exp underflows to exactly 0,
        # so they contribute nothing to the max / sum; real columns get the exact
        # softmax over num_actions (F.softmax on 2-D input == softmax over dim -1).
        m = jnp.max(logits, axis=-1, keepdims=True)
        e = jnp.exp(logits - m)
        s = jnp.sum(e, axis=-1, keepdims=True)
        out_ref[...] = e * pl.reciprocal(s, approx=False)       # exact: keeps 1e-5 tol

    return kernel


def init_params(key, state_len, rnn_size, num_layers, num_actions):
    """PyTorch-style U(-1/sqrt(H), 1/sqrt(H)) params: (wih, whh, bih, bhh) per layer."""
    bound = 1.0 / math.sqrt(rnn_size)
    params = {"gru": []}
    for l in range(num_layers):
        in_dim = state_len if l == 0 else rnn_size
        key, k0, k1, k2, k3 = jax.random.split(key, 5)
        wih = jax.random.uniform(k0, (3, in_dim, rnn_size), jnp.float32, -bound, bound)
        whh = jax.random.uniform(k1, (3, rnn_size, rnn_size), jnp.float32, -bound, bound)
        bih = jax.random.uniform(k2, (3, 1, rnn_size), jnp.float32, -bound, bound)
        bhh = jax.random.uniform(k3, (3, 1, rnn_size), jnp.float32, -bound, bound)
        params["gru"].append((wih, whh, bih, bhh))
    key, k0, k1 = jax.random.split(key, 3)
    params["w_out"] = jax.random.uniform(k0, (rnn_size, num_actions), jnp.float32, -bound, bound)
    params["b_out"] = jax.random.uniform(k1, (1, num_actions), jnp.float32, -bound, bound)
    return params


def pack_params(params):
    """Pack params for the kernel: fused / gate-packed f32 weight + bias slabs.

    whh is intentionally NOT packed: with a zero initial hidden state every
    h_prev @ whh term is exactly zero, so those weights never reach the kernel.
    With 3*rnn_size <= 128 all three gates share one 128-lane block (gate_stride
    == rnn_size); otherwise each gate gets its own 128-aligned block.
    The padded action columns of b_out are -1e30 so softmax sends them to 0.
    """
    gru = params["gru"]
    rnn_size = gru[0][0].shape[-1]
    state_len = gru[0][0].shape[1]
    num_actions = params["w_out"].shape[-1]

    H = rnn_size
    Hg = H if 3 * H <= 128 else _round_up(H, 128)      # gate stride in lanes
    Gp = _round_up(3 * Hg, 128)                        # fused gate width (lane multiple)
    Kp = _round_up(max(state_len, H), 8)               # padded contraction width
    Ap = _round_up(num_actions, 128)                   # lane-dense action width

    w_blocks, b_blocks = [], []
    for (wih, whh, bih, bhh) in gru:
        in_dim = wih.shape[1]
        w = jnp.zeros((Kp, Gp), jnp.float32)
        b = jnp.zeros((2, Gp), jnp.float32)
        for g in range(3):
            w = w.at[:in_dim, g * Hg:g * Hg + H].set(wih[g])
        b = b.at[0, 0 * Hg:0 * Hg + H].set((bih[0] + bhh[0])[0])   # r-gate bias (folded)
        b = b.at[0, 1 * Hg:1 * Hg + H].set((bih[1] + bhh[1])[0])   # z-gate bias (folded)
        b = b.at[0, 2 * Hg:2 * Hg + H].set(bih[2][0])              # n-gate input bias
        b = b.at[1, 2 * Hg:2 * Hg + H].set(bhh[2][0])              # n-gate r*bhh_n term
        w_blocks.append(w)
        b_blocks.append(b)

    w_out = jnp.zeros((Kp, Ap), jnp.float32).at[:H, :num_actions].set(params["w_out"])
    b_out = jnp.full((1, Ap), -1e30, jnp.float32).at[:, :num_actions].set(params["b_out"])
    return {
        "w_slab": jnp.stack(w_blocks),   # (L, Kp, Gp) f32
        "b_slab": jnp.stack(b_blocks),   # (L, 2, Gp)  f32
        "w_out": w_out,                  # (Kp, Ap)    f32
        "b_out": b_out,                  # (1, Ap)     f32
    }


@partial(jax.jit, static_argnames=("rnn_size", "num_actions"))
def drqn_forward(x, packed, *, rnn_size, num_actions):
    """x: (seq=1, batch, state_len), PyTorch nn.GRU seq-major layout."""
    seq, n_batch, state_len = x.shape
    if seq != 1:
        # The PyTorch module's reshape x1.reshape(x1.size()[1:]) only works for seq == 1.
        raise ValueError("DRQN.forward requires seq_len == 1")

    w_slab, b_slab = packed["w_slab"], packed["b_slab"]
    w_out, b_out = packed["w_out"], packed["b_out"]
    num_layers, Kp, _ = w_slab.shape
    Ap = w_out.shape[-1]
    H = rnn_size
    Hg = H if 3 * H <= 128 else _round_up(H, 128)
    Np = _round_up(n_batch, 8)                       # sublane-align the batch dim

    x2d = (
        jnp.zeros((Np, Kp), jnp.float32)
        .at[:n_batch, :state_len]
        .set(x.reshape(n_batch, state_len).astype(jnp.float32))
    )

    out = pl.pallas_call(
        _drqn_kernel(num_layers, H, Hg, Kp),
        out_shape=jax.ShapeDtypeStruct((Np, Ap), jnp.float32),
        in_specs=[pl.BlockSpec(memory_space=pltpu.MemorySpace.VMEM)] * 5,
        out_specs=pl.BlockSpec(memory_space=pltpu.MemorySpace.VMEM),
    )(x2d, w_slab, b_slab, w_out, b_out)
    return out[:n_batch, :num_actions]


def drqn_reference(x, params):
    """Pure-JAX reference matching PyTorch nn.GRU + Linear + softmax.

    Keeps the full GRU math (including the h_prev @ whh terms the kernel drops
    algebraically with h0 == 0), so it also validates that simplification.
    """
    seq, n_batch, _ = x.shape
    h = x.reshape(n_batch, -1).astype(jnp.float32)
    for (wih, whh, bih, bhh) in params["gru"]:
        hidden = whh.shape[-1]
        h_prev = jnp.zeros((n_batch, hidden), jnp.float32)
        r = jax.nn.sigmoid(h @ wih[0] + bih[0] + h_prev @ whh[0] + bhh[0])
        z = jax.nn.sigmoid(h @ wih[1] + bih[1] + h_prev @ whh[1] + bhh[1])
        n = jnp.tanh(h @ wih[2] + bih[2] + r * (h_prev @ whh[2] + bhh[2]))
        h = (1.0 - z) * n + z * h_prev
    logits = h @ params["w_out"] + params["b_out"]
    return jax.nn.softmax(logits, axis=-1)


if __name__ == "__main__":
    state_len, rnn_size, num_layers, num_actions = 8, 32, 2, 6
    batch = 4

    key = jax.random.PRNGKey(0)
    key, pkey, xkey = jax.random.split(key, 3)
    params = init_params(pkey, state_len, rnn_size, num_layers, num_actions)
    packed = pack_params(params)
    x = jax.random.normal(xkey, (1, batch, state_len), jnp.float32)

    out = jax.block_until_ready(
        drqn_forward(x, packed, rnn_size=rnn_size, num_actions=num_actions))
    ref = drqn_reference(x, params)

    assert out.shape == (batch, num_actions)
    assert jnp.allclose(out, ref, atol=1e-5, rtol=1e-5), "mismatch vs reference"
    assert jnp.allclose(jnp.sum(out, axis=-1), 1.0, atol=1e-5), "softmax rows must sum to 1"

    print("KERNEL_OK")
</pallas_src>

<mosaic_0001>
module attributes {stable_mosaic.version = 11 : i64} {
  func.func @kernel(%arg0: memref<8x32xf32, #tpu.memory_space<vmem>>, %arg1: memref<2x32x128xf32, #tpu.memory_space<vmem>>, %arg2: memref<2x2x128xf32, #tpu.memory_space<vmem>>, %arg3: memref<32x128xf32, #tpu.memory_space<vmem>>, %arg4: memref<1x128xf32, #tpu.memory_space<vmem>>, %arg5: memref<8x128xf32, #tpu.memory_space<vmem>>) attributes {dimension_semantics = [], scalar_prefetch = 0 : i64, scratch_operands = 0 : i64, tpu.core_type = #tpu.core_type<tc>} {
    %c0 = arith.constant 0 : index
    %c0_0 = arith.constant 0 : index
    %0 = vector.load %arg0[%c0, %c0_0] : memref<8x32xf32, #tpu.memory_space<vmem>>, vector<8x32xf32>
    %c0_1 = arith.constant 0 : index
    %c0_2 = arith.constant 0 : index
    %c0_3 = arith.constant 0 : index
    %1 = vector.load %arg1[%c0_1, %c0_2, %c0_3] : memref<2x32x128xf32, #tpu.memory_space<vmem>>, vector<1x32x128xf32>
    %2 = vector.shape_cast %1 : vector<1x32x128xf32> to vector<32x128xf32>
    %c0_4 = arith.constant 0 : index
    %c0_5 = arith.constant 0 : index
    %c0_6 = arith.constant 0 : index
    %3 = vector.load %arg2[%c0_4, %c0_5, %c0_6] : memref<2x2x128xf32, #tpu.memory_space<vmem>>, vector<1x2x128xf32>
    %4 = vector.shape_cast %3 : vector<1x2x128xf32> to vector<2x128xf32>
    %cst = arith.constant dense<0.000000e+00> : vector<8x128xf32>
    %5 = tpu.matmul %0, %2, %cst {dimension_numbers = #tpu.dot_dimension_numbers<[1], [0], [0], [1], [0, 0, 1, 1], [], []>} : vector<8x32xf32>, vector<32x128xf32>, vector<8x128xf32> -> vector<8x128xf32>
    %6 = vector.extract_strided_slice %4 {offsets = [0, 0], sizes = [1, 128], strides = [1, 1]} : vector<2x128xf32> to vector<1x128xf32>
    %7 = vector.broadcast %6 : vector<1x128xf32> to vector<8x128xf32>
    %8 = arith.addf %5, %7 : vector<8x128xf32>
    %9 = vector.extract_strided_slice %8 {offsets = [0, 0], sizes = [8, 32], strides = [1, 1]} : vector<8x128xf32> to vector<8x32xf32>
    %10 = arith.negf %9 : vector<8x32xf32>
    %11 = math.exp %10 : vector<8x32xf32>
    %cst_7 = arith.constant 1.000000e+00 : f32
    %12 = vector.broadcast %cst_7 : f32 to vector<8x32xf32>
    %13 = arith.addf %12, %11 : vector<8x32xf32>
    %14 = arith.divf %12, %13 : vector<8x32xf32>
    %15 = vector.extract_strided_slice %8 {offsets = [0, 32], sizes = [8, 32], strides = [1, 1]} : vector<8x128xf32> to vector<8x32xf32>
    %16 = arith.negf %15 : vector<8x32xf32>
    %17 = math.exp %16 : vector<8x32xf32>
    %cst_8 = arith.constant 1.000000e+00 : f32
    %18 = vector.broadcast %cst_8 : f32 to vector<8x32xf32>
    %19 = arith.addf %18, %17 : vector<8x32xf32>
    %20 = arith.divf %18, %19 : vector<8x32xf32>
    %21 = vector.extract_strided_slice %8 {offsets = [0, 64], sizes = [8, 32], strides = [1, 1]} : vector<8x128xf32> to vector<8x32xf32>
    %22 = vector.extract_strided_slice %4 {offsets = [1, 64], sizes = [1, 32], strides = [1, 1]} : vector<2x128xf32> to vector<1x32xf32>
    %23 = vector.broadcast %22 : vector<1x32xf32> to vector<8x32xf32>
    %24 = arith.mulf %14, %23 : vector<8x32xf32>
    %25 = arith.addf %21, %24 : vector<8x32xf32>
    %26 = math.tanh %25 : vector<8x32xf32>
    %cst_9 = arith.constant 1.000000e+00 : f32
    %27 = vector.broadcast %cst_9 : f32 to vector<8x32xf32>
    %28 = arith.subf %27, %20 : vector<8x32xf32>
    %29 = arith.mulf %28, %26 : vector<8x32xf32>
    %c1 = arith.constant 1 : index
    %c0_10 = arith.constant 0 : index
    %c0_11 = arith.constant 0 : index
    %30 = vector.load %arg1[%c1, %c0_10, %c0_11] : memref<2x32x128xf32, #tpu.memory_space<vmem>>, vector<1x32x128xf32>
    %31 = vector.shape_cast %30 : vector<1x32x128xf32> to vector<32x128xf32>
    %c1_12 = arith.constant 1 : index
    %c0_13 = arith.constant 0 : index
    %c0_14 = arith.constant 0 : index
    %32 = vector.load %arg2[%c1_12, %c0_13, %c0_14] : memref<2x2x128xf32, #tpu.memory_space<vmem>>, vector<1x2x128xf32>
    %33 = vector.shape_cast %32 : vector<1x2x128xf32> to vector<2x128xf32>
    %cst_15 = arith.constant dense<0.000000e+00> : vector<8x128xf32>
    %34 = tpu.matmul %29, %31, %cst_15 {dimension_numbers = #tpu.dot_dimension_numbers<[1], [0], [0], [1], [0, 0, 1, 1], [], []>} : vector<8x32xf32>, vector<32x128xf32>, vector<8x128xf32> -> vector<8x128xf32>
    %35 = vector.extract_strided_slice %33 {offsets = [0, 0], sizes = [1, 128], strides = [1, 1]} : vector<2x128xf32> to vector<1x128xf32>
    %36 = vector.broadcast %35 : vector<1x128xf32> to vector<8x128xf32>
    %37 = arith.addf %34, %36 : vector<8x128xf32>
    %38 = vector.extract_strided_slice %37 {offsets = [0, 0], sizes = [8, 32], strides = [1, 1]} : vector<8x128xf32> to vector<8x32xf32>
    %39 = arith.negf %38 : vector<8x32xf32>
    %40 = math.exp %39 : vector<8x32xf32>
    %cst_16 = arith.constant 1.000000e+00 : f32
    %41 = vector.broadcast %cst_16 : f32 to vector<8x32xf32>
    %42 = arith.addf %41, %40 : vector<8x32xf32>
    %43 = arith.divf %41, %42 : vector<8x32xf32>
    %44 = vector.extract_strided_slice %37 {offsets = [0, 32], sizes = [8, 32], strides = [1, 1]} : vector<8x128xf32> to vector<8x32xf32>
    %45 = arith.negf %44 : vector<8x32xf32>
    %46 = math.exp %45 : vector<8x32xf32>
    %cst_17 = arith.constant 1.000000e+00 : f32
    %47 = vector.broadcast %cst_17 : f32 to vector<8x32xf32>
    %48 = arith.addf %47, %46 : vector<8x32xf32>
    %49 = arith.divf %47, %48 : vector<8x32xf32>
    %50 = vector.extract_strided_slice %37 {offsets = [0, 64], sizes = [8, 32], strides = [1, 1]} : vector<8x128xf32> to vector<8x32xf32>
    %51 = vector.extract_strided_slice %33 {offsets = [1, 64], sizes = [1, 32], strides = [1, 1]} : vector<2x128xf32> to vector<1x32xf32>
    %52 = vector.broadcast %51 : vector<1x32xf32> to vector<8x32xf32>
    %53 = arith.mulf %43, %52 : vector<8x32xf32>
    %54 = arith.addf %50, %53 : vector<8x32xf32>
    %55 = math.tanh %54 : vector<8x32xf32>
    %cst_18 = arith.constant 1.000000e+00 : f32
    %56 = vector.broadcast %cst_18 : f32 to vector<8x32xf32>
    %57 = arith.subf %56, %49 : vector<8x32xf32>
    %58 = arith.mulf %57, %55 : vector<8x32xf32>
    %c0_19 = arith.constant 0 : index
    %c0_20 = arith.constant 0 : index
    %59 = vector.load %arg3[%c0_19, %c0_20] : memref<32x128xf32, #tpu.memory_space<vmem>>, vector<32x128xf32>
    %cst_21 = arith.constant dense<0.000000e+00> : vector<8x128xf32>
    %60 = tpu.matmul %58, %59, %cst_21 {dimension_numbers = #tpu.dot_dimension_numbers<[1], [0], [0], [1], [0, 0, 1, 1], [], []>} : vector<8x32xf32>, vector<32x128xf32>, vector<8x128xf32> -> vector<8x128xf32>
    %c0_22 = arith.constant 0 : index
    %c0_23 = arith.constant 0 : index
    %61 = vector.load %arg4[%c0_22, %c0_23] : memref<1x128xf32, #tpu.memory_space<vmem>>, vector<1x128xf32>
    %62 = vector.broadcast %61 : vector<1x128xf32> to vector<8x128xf32>
    %63 = arith.addf %60, %62 : vector<8x128xf32>
    %cst_24 = arith.constant dense<0xFF800000> : vector<8xf32>
    %64 = vector.multi_reduction <maximumf>, %63, %cst_24 [1] : vector<8x128xf32> to vector<8xf32>
    %65 = vector.shape_cast %64 : vector<8xf32> to vector<8x1xf32>
    %66 = vector.broadcast %65 : vector<8x1xf32> to vector<8x128xf32>
    %67 = arith.subf %63, %66 : vector<8x128xf32>
    %68 = math.exp %67 : vector<8x128xf32>
    %cst_25 = arith.constant dense<0.000000e+00> : vector<8xf32>
    %69 = vector.multi_reduction <add>, %68, %cst_25 [1] : vector<8x128xf32> to vector<8xf32>
    %70 = vector.shape_cast %69 : vector<8xf32> to vector<8x1xf32>
    %71 = tpu.reciprocal %70 : vector<8x1xf32> -> vector<8x1xf32>
    %72 = vector.broadcast %71 : vector<8x1xf32> to vector<8x128xf32>
    %73 = arith.mulf %68, %72 : vector<8x128xf32>
    %c0_26 = arith.constant 0 : index
    %c0_27 = arith.constant 0 : index
    %74 = vector.load %arg5[%c0_26, %c0_27] : memref<8x128xf32, #tpu.memory_space<vmem>>, vector<8x128xf32>
    tpu.vector_store %arg5[%c0_26, %c0_27], %73 {strides = array<i32>} : memref<8x128xf32, #tpu.memory_space<vmem>>, vector<8x128xf32>,
    return
  }
}

</mosaic_0001>

<bundles_post_ra>
// kernel: drqn_forward.1
= control target key start
LH: loop header
LB: loop body
LE: loop exit
PB: predicated region body
PF: predicated region fallthrough
CT: control target
= control target key end

     0   :  { %10 = vsyncpa [#allocation3], 0  ;;  %s401_s0 = inlined_call_operand.vmem [shape: f32[8,32], index: 0, kind: input, shape index: {}]   ;;  %s402_s1 = inlined_call_operand.hbm [shape: f32[2,32,128], index: 1, kind: input, shape index: {}]   ;;  %s403_s2 = inlined_call_operand.vmem [shape: f32[2,2,128], index: 2, kind: input, shape index: {}]   ;;  %s404_s3 = inlined_call_operand.hbm [shape: f32[32,128], index: 3, kind: input, shape index: {}]   ;;  %s405_s4 = inlined_call_operand.vmem [shape: f32[1,128], index: 4, kind: input, shape index: {}]   ;;  %s406_s5 = inlined_call_operand.vmem [shape: f32[8,128], index: 5, kind: output, shape index: {}]  }
   0x1   :  { %s18_s20 = sshll.u32 %s402_s1, 4  ;;  %s19_s20 = int_to_ptr.hbm [resolvable:$true] %s18_s20 }
   0x2   :  { %11 = vsyncpa [#allocation5], 0  ;;  %s333_s21 = smov [#allocation2]   ;;  %s33_s25 = sshll.u32 %s404_s3, 4  ;;  %s34_s25 = int_to_ptr.hbm [resolvable:$true] %s33_s25 }
   0x3   :  { %s20_s22 = sshll.u32 %s333_s21, 4  ;;  %s334_s26 = smov 128   ;;  %s21_s22 = int_to_ptr.vmem [resolvable:$true] %s20_s22 }
   0x4   :  { %s335_s27 = smov 8   ;;  %s336_s28 = smov [#allocation4]  }
   0x5   :  { %26 = dma.hbm_to_vmem [thread:$0]  %s19_s20, 1024, %s21_s22, [#allocation3], %s334_s26, %s334_s26, %s335_s27  }
   0x6   :  { %s35_s29 = sshll.u32 %s336_s28, 4  ;;  %s36_s29 = int_to_ptr.vmem [resolvable:$true] %s35_s29 }
   0x7   :  { %41 = dma.hbm_to_vmem [thread:$0]  %s34_s25, 512, %s36_s29, [#allocation5], %s334_s26, %s334_s26, %s335_s27  }
   0x8   :  { %329 = dma.done.wait [#allocation3], 1024  }
   0x9   :  { %330 = vsyncadd [#allocation3], 4294966272 }
   0xa   :  { %331 = dma.done.wait [#allocation5], 512  }
   0xb   :  { %332 = vsyncadd [#allocation5], 4294966784  ;;  %v56_v0 = vld [vmem:[#allocation2 + $0x18] sm:$0xff]  ;;  %v55_v1 = vld [vmem:[#allocation2 + $0x10] sm:$0xff]  ;;  %s337_s3 = smov 64   ;;  %vm59_vm0 = vcmask 261120  }
   0xc   :  { %75 = vmatpush.msra.mxu0 %v56_v0  ;;  %v57_v2 = vld [vmem:[%s403_s2] sm:$0x3]  ;;  %v54_v3 = vld [vmem:[#allocation2 + $0x8] sm:$0xff]  ;;  %v124_v28 = vld [vmem:[#allocation2 + $0x38] sm:$0xff] }
   0xd   :  { %v102_v4 = vperm.slane %v57_v2, 1  ;;  %v53_v5 = vld [vmem:[#allocation2] sm:$0xff]  ;;  %v58_v7 = vperm.slane %v57_v2, 0  ;;  %v123_v29 = vld [vmem:[#allocation2 + $0x30] sm:$0xff]  ;;  %145 = vmatpush.msra.mxu1 %v124_v28  ;;  %v122_v30 = vld [vmem:[#allocation2 + $0x28] sm:$0xff] }
   0xe   :  { %76 = vmatpush.msra.mxu0 %v55_v1  ;;  %v52_v6 = vld [vmem:[%s401_s0] sm:$0xff]  ;;  %s338_s0 = smov 96   ;;  %v193_v59 = vld [vmem:[#allocation4 + $0x18] sm:$0xff]  ;;  %v192_v60 = vld [vmem:[#allocation4 + $0x10] sm:$0xff] }
   0xf   :  { %104 = vrot.lane.b32.xlu0 %v102_v4, %s337_s3  ;;  %146 = vmatpush.msra.mxu1 %v123_v29  ;;  %v121_v31 = vld [vmem:[#allocation2 + $0x20] sm:$0xff]  ;;  %v191_v61 = vld [vmem:[#allocation4 + $0x8] sm:$0xff] }
  0x10   :  { %77 = vmatpush.msra.mxu0 %v54_v3  ;;  %v254_v35 = vld [vmem:[%s403_s2 + $0x2] sm:$0x3]  ;;  %215 = vmatpush.msra.mxu2 %v193_v59  ;;  %v264_v3 = vld [vmem:[%s405_s4] ss:$0 sm:$0xff] }
  0x11   :  { %147 = vmatpush.msra.mxu1 %v122_v30  ;;  %v172_v36 = vperm.slane %v254_v35, 1  ;;  %v127_v38 = vperm.slane %v254_v35, 0  ;;  %v190_v62 = vld [vmem:[#allocation4] sm:$0xff] }
  0x12   :  { %78 = vmatpush.msra.mxu0 %v53_v5  ;;  %216 = vmatpush.msra.mxu2 %v192_v60 }
  0x13   :  { %252 = vmatmul.msk.f32.vlgmr.msra.gmra.mxu0 %vm59_vm0, %v52_v6  ;;  %148 = vmatpush.msra.mxu1 %v121_v31 }
  0x14   :  { %174 = vrot.lane.b32.xlu2 %v172_v36, %s337_s3  ;;  %217 = vmatpush.msra.mxu2 %v191_v61 }
  0x16   :  { %218 = vmatpush.msra.mxu2 %v190_v62 }
  0x6e   :  { %v175_v51 = vpop.permute.xlu2 %174 }
  0x81   :  { %v105_v20 = vpop.permute.xlu0 %104 }
  0x90   :  { %v80_v8 = vpop.f32.mrf.mxu0 }
  0x91   :  { %v81_v9 = vadd.f32 %v80_v8, %v58_v7 }
  0x93   :  { %v253_v10 = vmul.f32 -1.442695, %v81_v9 }
  0x95   :  { %265 = vpow2.f32 %v253_v10 }
  0x9b   :  { %v266_v11 = vpop.eup %265 }
  0x9c   :  { %v86_v12 = vadd.f32 1.0, %v266_v11 }
  0x9e   :  { %267 = vrcp.f32 %v86_v12  ;;  %v98_v16 = vand.u32 2147483648, %v86_v12  ;;  %v96_v18 = vand.u32 2147483647, %v86_v12  ;;  %vm92_vm2 = vweird.f32 %v86_v12 }
  0xa0   :  { %v99_v21 = vor.u32 1.1754944e-38, %v98_v16  ;;  %vm97_vm4 = vcmp.eq.f32.partialorder %v96_v18, 8.507059e+37 }
  0xa4   :  { %v268_v13 = vpop.eup %267 }
  0xa5   :  { %v88_v14 = vmul.f32 %v268_v13, %v86_v12  ;;  %vm93_vm1 = vweird.f32 %v268_v13 }
  0xa6   :  { %vm94_vm3 = vmor %vm92_vm2, %vm93_vm1 }
  0xa7   :  { %v89_v15 = vsub.f32 1.0, %v88_v14 }
  0xa9   :  { %v90_v17 = vmul.f32 %v268_v13, %v89_v15 }
  0xab   :  { %v91_v19 = vadd.f32 %v268_v13, %v90_v17 }
  0xad   :  { %v95_v22 = vsel %vm94_vm3, %v268_v13, %v91_v19 }
  0xae   :  { %v100_v23 = vsel %vm97_vm4, %v99_v21, %v95_v22 }
  0xaf   :  { %v107_v24 = vmul.f32 %v105_v20, %v100_v23  ;;  %v114_v32 = vsub.f32 1.0, %v100_v23 }
  0xb1   :  { %109 = vrot.lane.b32.xlu0 %v107_v24, %s337_s3 }
 0x123   :  { %v110_v25 = vpop.permute.xlu0 %109 }
 0x124   :  { %v112_v26 = vadd.f32 %v110_v25, %v81_v9 }
 0x126   :  { %269 = vtanh.f32 %v112_v26 }
 0x12c   :  { %v270_v27 = vpop.eup %269 }
 0x12d   :  { %116 = vrot.lane.b32.xlu1 %v270_v27, %s338_s0 }
 0x19f   :  { %v117_v33 = vpop.permute.xlu1 %116 }
 0x1a0   :  { %v119_v34 = vmul.f32 %v117_v33, %v114_v32 }
 0x1a2   :  { %129 = vrot.lane.b32.xlu1 %v119_v34, %s338_s0 }
 0x214   :  { %v130_v37 = vpop.permute.xlu1 %129 }
 0x215   :  { %255 = vmatmul.msk.f32.vlgmr.msra.gmra.mxu1 %vm59_vm0, %v130_v37 }
 0x292   :  { %v150_v39 = vpop.f32.mrf.mxu1 }
 0x293   :  { %v151_v40 = vadd.f32 %v150_v39, %v127_v38 }
 0x295   :  { %v256_v41 = vmul.f32 -1.442695, %v151_v40 }
 0x297   :  { %271 = vpow2.f32 %v256_v41 }
 0x29d   :  { %v272_v42 = vpop.eup %271 }
 0x29e   :  { %v156_v43 = vadd.f32 1.0, %v272_v42 }
 0x2a0   :  { %273 = vrcp.f32 %v156_v43  ;;  %v168_v47 = vand.u32 2147483648, %v156_v43  ;;  %v166_v49 = vand.u32 2147483647, %v156_v43  ;;  %vm162_vm6 = vweird.f32 %v156_v43 }
 0x2a2   :  { %v169_v52 = vor.u32 1.1754944e-38, %v168_v47  ;;  %vm167_vm8 = vcmp.eq.f32.partialorder %v166_v49, 8.507059e+37 }
 0x2a6   :  { %v274_v44 = vpop.eup %273 }
 0x2a7   :  { %v158_v45 = vmul.f32 %v274_v44, %v156_v43  ;;  %vm163_vm5 = vweird.f32 %v274_v44 }
 0x2a8   :  { %vm164_vm7 = vmor %vm162_vm6, %vm163_vm5 }
 0x2a9   :  { %v159_v46 = vsub.f32 1.0, %v158_v45 }
 0x2ab   :  { %v160_v48 = vmul.f32 %v274_v44, %v159_v46 }
 0x2ad   :  { %v161_v50 = vadd.f32 %v274_v44, %v160_v48 }
 0x2af   :  { %v165_v53 = vsel %vm164_vm7, %v274_v44, %v161_v50 }
 0x2b0   :  { %v170_v54 = vsel %vm167_vm8, %v169_v52, %v165_v53 }
 0x2b1   :  { %v177_v55 = vmul.f32 %v175_v51, %v170_v54  ;;  %v184_v63 = vsub.f32 1.0, %v170_v54 }
 0x2b3   :  { %179 = vrot.lane.b32.xlu2 %v177_v55, %s337_s3 }
 0x30d   :  { %v180_v56 = vpop.permute.xlu2 %179 }
 0x30e   :  { %v182_v57 = vadd.f32 %v180_v56, %v151_v40 }
 0x310   :  { %275 = vtanh.f32 %v182_v57 }
 0x316   :  { %v276_v58 = vpop.eup %275 }
 0x317   :  { %186 = vrot.lane.b32.xlu0 %v276_v58, %s338_s0 }
 0x389   :  { %v187_v0 = vpop.permute.xlu0 %186 }
 0x38a   :  { %v189_v1 = vmul.f32 %v187_v0, %v184_v63 }
 0x38c   :  { %199 = vrot.lane.b32.xlu1 %v189_v1, %s338_s0 }
 0x3fe   :  { %v200_v2 = vpop.permute.xlu1 %199 }
 0x3ff   :  { %257 = vmatmul.msk.f32.vlgmr.msra.gmra.mxu2 %vm59_vm0, %v200_v2 }
 0x482   :  { %v220_v4 = vpop.f32.mrf.mxu2 }
 0x483   :  { %v221_v5 = vadd.f32 %v264_v3, %v220_v4 }
 0x485   :  { %223 = vmax.xlane.f32.xlu2 %v221_v5 }
 0x4f8   :  { %v224_v6 = vpop.xlane.xlu2 %223 }
 0x4f9   :  { %v225_v7 = vsub.f32 %v221_v5, %v224_v6 }
 0x4fb   :  { %v226_v8 = vmul.f32 1.442695, %v225_v7 }
 0x4fd   :  { %277 = vpow2.f32 %v226_v8 }
 0x503   :  { %v278_v9 = vpop.eup %277 }
 0x504   :  { %228 = vadd.xlane.f32.xlu0 %v278_v9 }
 0x577   :  { %v229_v10 = vpop.xlane.xlu0 %228 }
 0x578   :  { %279 = vrcp.f32 %v229_v10  ;;  %v241_v14 = vand.u32 2147483648, %v229_v10  ;;  %v239_v16 = vand.u32 2147483647, %v229_v10  ;;  %vm235_vm10 = vweird.f32 %v229_v10 }
 0x57a   :  { %v242_v18 = vor.u32 1.1754944e-38, %v241_v14  ;;  %vm240_vm12 = vcmp.eq.f32.partialorder %v239_v16, 8.507059e+37 }
 0x57e   :  { %v280_v11 = vpop.eup %279 }
 0x57f   :  { %v231_v12 = vmul.f32 %v280_v11, %v229_v10  ;;  %vm236_vm9 = vweird.f32 %v280_v11 }
 0x580   :  { %vm237_vm11 = vmor %vm235_vm10, %vm236_vm9 }
 0x581   :  { %v232_v13 = vsub.f32 1.0, %v231_v12 }
 0x583   :  { %v233_v15 = vmul.f32 %v280_v11, %v232_v13 }
 0x585   :  { %v234_v17 = vadd.f32 %v280_v11, %v233_v15 }
 0x587   :  { %v238_v19 = vsel %vm237_vm11, %v280_v11, %v234_v17 }
 0x588   :  { %v243_v20 = vsel %vm240_vm12, %v242_v18, %v238_v19 }
 0x589   :  { %v244_v21 = vmul.f32 %v278_v9, %v243_v20 }
 0x58b   :  { %245 = vst [vmem:[%s406_s5] sm:$0xff] %v244_v21 }
 0x58c   :  { %250 = vsyncpa [#allocation3], 1 }
 0x58d   :  { %251 = vsyncpa [#allocation5], 1 }

</bundles_post_ra>
